<compile_context>
chip_gen: v7x
topology: tpu7x:2x2x1
jax: 0.10.0
libtpu: 0.0.40
codegen_flags: <defaults>
</compile_context>

<pallas_src>
import jax
import jax.numpy as jnp
from jax.experimental import pallas as pl
from jax.experimental.pallas import tpu as pltpu

IN_DIM = 10        # MLPModule: Linear(10 -> 16) -> ReLU -> Linear(16 -> 10)
HID_DIM = 16
LANE = 128
DEFAULT_BATCH_TILE = 65536          # lanes per grid step (per-generation safe)
VMEM_LIMIT_BYTES = 48 * 1024 * 1024  # explicit scoped-VMEM limit (fits v7x 64MiB)


def _cdiv(a, b):
    return -(-a // b)


def _round_up(x, m):
    return _cdiv(x, m) * m


def _mlp2_kernel(x_ref, w1_ref, b1_ref, w23_ref, b23_ref, w4_ref, b4_ref, o_ref):
    """Fused SimpleModel forward in feature-major / batch-on-lanes layout.

    x_ref   : (10, Bt) activations, batch on the lane axis
    w1_ref  : (16, 10)  W1^T           b1_ref  : (16, 1)
    w23_ref : (16, 16)  (W2 @ W3)^T    b23_ref : (16, 1)  (b2 @ W3 + b3)^T
    w4_ref  : (10, 16)  W4^T           b4_ref  : (10, 1)
    o_ref   : (10, Bt)
    """
    x = x_ref[...]
    # mlp_0.net1 + ReLU
    h = jnp.maximum(
        jnp.dot(w1_ref[...], x, preferred_element_type=jnp.float32) + b1_ref[...],
        0.0)
    # mlp_0.net2 and mlp_1.net1 fused (no ReLU between them) + ReLU
    h = jnp.maximum(
        jnp.dot(w23_ref[...], h, preferred_element_type=jnp.float32) + b23_ref[...],
        0.0)
    # mlp_1.net2
    o_ref[...] = (
        jnp.dot(w4_ref[...], h, preferred_element_type=jnp.float32) + b4_ref[...])


def _choose_batch_tile(B, max_tile):
    """Pick a lane-aligned batch tile.

    - always a multiple of 128 (robust to arbitrary caller batch_tile),
    - >= 2 grid steps whenever B > 128 (v7x: both TensorCores get work),
    - step count derived from B so last-block padding waste stays small
      instead of padding up to a nearly-empty full-size tile.
    """
    max_tile = _round_up(max(int(max_tile), LANE), LANE)
    b_lanes = _round_up(B, LANE)
    if b_lanes <= LANE:
        return LANE                         # tiny batch: one small step
    n_steps = max(2, _cdiv(b_lanes, max_tile))
    return _round_up(_cdiv(b_lanes, n_steps), LANE)


def _pack_params(params):
    """Fuse the ReLU-free middle linears and transpose for feature-major use."""
    w23 = params["w2"] @ params["w3"]                    # (16, 16)
    b23 = params["b2"] @ params["w3"] + params["b3"]     # (1, 16)
    return (params["w1"].T, params["b1"].T,              # (16,10), (16,1)
            w23.T, b23.T,                                # (16,16), (16,1)
            params["w4"].T, params["b4"].T)              # (10,16), (10,1)


def simple_model_forward_feature_major(x_fm, params, *,
                                       batch_tile=DEFAULT_BATCH_TILE):
    """Fast path: x_fm is (10, B) feature-major, returns (10, B) feature-major.

    No wrapper-side transposes; the only extra HBM pass is a lane pad/slice
    when B is not a multiple of the chosen tile.
    """
    D, B = x_fm.shape
    assert D == IN_DIM, x_fm.shape
    w1t, b1c, w23t, b23c, w4t, b4c = _pack_params(params)

    tile = _choose_batch_tile(B, batch_tile)
    b_pad = _round_up(B, tile)
    if b_pad != B:
        x_fm = jnp.pad(x_fm, ((0, 0), (0, b_pad - B)))
    grid = (b_pad // tile,)

    per_col_macs = HID_DIM * IN_DIM + HID_DIM * HID_DIM + IN_DIM * HID_DIM
    param_bytes = 4 * (2 * HID_DIM * IN_DIM + HID_DIM * HID_DIM
                       + 2 * HID_DIM + IN_DIM)
    cost = pl.CostEstimate(
        flops=2 * per_col_macs * b_pad,
        transcendentals=0,
        bytes_accessed=2 * b_pad * IN_DIM * 4 + param_bytes,
    )

    y_fm = pl.pallas_call(
        _mlp2_kernel,
        out_shape=jax.ShapeDtypeStruct((IN_DIM, b_pad), jnp.float32),
        grid_spec=pltpu.PrefetchScalarGridSpec(
            num_scalar_prefetch=0,
            grid=grid,
            in_specs=[
                pl.BlockSpec((IN_DIM, tile), lambda i: (0, i)),        # x
                pl.BlockSpec((HID_DIM, IN_DIM), lambda i: (0, 0)),     # W1^T
                pl.BlockSpec((HID_DIM, 1), lambda i: (0, 0)),          # b1
                pl.BlockSpec((HID_DIM, HID_DIM), lambda i: (0, 0)),    # (W2 W3)^T
                pl.BlockSpec((HID_DIM, 1), lambda i: (0, 0)),          # b2 W3 + b3
                pl.BlockSpec((IN_DIM, HID_DIM), lambda i: (0, 0)),     # W4^T
                pl.BlockSpec((IN_DIM, 1), lambda i: (0, 0)),           # b4
            ],
            out_specs=pl.BlockSpec((IN_DIM, tile), lambda i: (0, i)),
        ),
        compiler_params=pltpu.CompilerParams(
            dimension_semantics=("parallel",),     # batch axis shards across TCs
            vmem_limit_bytes=VMEM_LIMIT_BYTES,
        ),
        cost_estimate=cost,
    )(x_fm, w1t, b1c, w23t, b23c, w4t, b4c)

    return y_fm if b_pad == B else y_fm[:, :B]


def simple_model_forward(x, params, *, batch_tile=DEFAULT_BATCH_TILE):
    """PyTorch-shaped interface: x (B, 10) -> (B, 10).

    Keeps the module's batch-major contract; the two 10-row transposes here
    are pure interface plumbing — callers that can hold feature-major
    activations should use simple_model_forward_feature_major directly.
    """
    B, D = x.shape
    assert D == IN_DIM
    y_fm = simple_model_forward_feature_major(x.T, params, batch_tile=batch_tile)
    return y_fm.T


def init_params(key):
    """Deterministic nn.Linear-style init: U(-1/sqrt(fan_in), 1/sqrt(fan_in)).

    Weights stored as (in_features, out_features); biases as (1, out_features).
    """
    def linear(key, fan_in, fan_out):
        kw, kb = jax.random.split(key)
        bound = 1.0 / jnp.sqrt(jnp.float32(fan_in))
        w = jax.random.uniform(kw, (fan_in, fan_out), jnp.float32, -bound, bound)
        b = jax.random.uniform(kb, (1, fan_out), jnp.float32, -bound, bound)
        return w, b

    k1, k2, k3, k4 = jax.random.split(key, 4)
    w1, b1 = linear(k1, IN_DIM, HID_DIM)   # mlp_0.net1
    w2, b2 = linear(k2, HID_DIM, IN_DIM)   # mlp_0.net2
    w3, b3 = linear(k3, IN_DIM, HID_DIM)   # mlp_1.net1
    w4, b4 = linear(k4, HID_DIM, IN_DIM)   # mlp_1.net2
    return dict(w1=w1, b1=b1, w2=w2, b2=b2, w3=w3, b3=b3, w4=w4, b4=b4)


def reference_forward(x, p):
    def mlp(x, w_a, b_a, w_b, b_b):
        return jnp.maximum(x @ w_a + b_a, 0.0) @ w_b + b_b
    y0 = mlp(x, p["w1"], p["b1"], p["w2"], p["b2"])
    return mlp(y0, p["w3"], p["b3"], p["w4"], p["b4"])


if __name__ == "__main__":
    key = jax.random.PRNGKey(0)
    kx, kp = jax.random.split(key)
    params = init_params(kp)

    # Small shape consistent with the module (batch=8, features=10).
    x = jax.random.normal(kx, (8, IN_DIM), jnp.float32)
    out = jax.block_until_ready(simple_model_forward(x, params))
    ref = reference_forward(x, params)
    assert out.shape == (8, IN_DIM), out.shape
    assert jnp.allclose(out, ref, atol=1e-4, rtol=1e-4), "mismatch vs JAX reference"

    # Feature-major fast path (no wrapper layout ops) must agree as well.
    out_fm = jax.block_until_ready(
        simple_model_forward_feature_major(x.T, params))
    assert out_fm.shape == (IN_DIM, 8), out_fm.shape
    assert jnp.allclose(out_fm.T, ref, atol=1e-4, rtol=1e-4), "feature-major mismatch"

    # Ragged batch exercising the padded, multi-step (grid >= 2) path.
    x2 = jax.random.normal(kx, (300, IN_DIM), jnp.float32)
    out2 = jax.block_until_ready(simple_model_forward(x2, params))
    ref2 = reference_forward(x2, params)
    assert out2.shape == (300, IN_DIM), out2.shape
    assert jnp.allclose(out2, ref2, atol=1e-4, rtol=1e-4), "mismatch vs JAX reference"

    print("KERNEL_OK")
</pallas_src>

<mosaic_0001>
module attributes {stable_mosaic.version = 11 : i64} {
  func.func @_mlp2_kernel(%arg0: i32, %arg1: memref<10x128xf32, #tpu.memory_space<vmem>>, %arg2: memref<16x10xf32, #tpu.memory_space<vmem>>, %arg3: memref<16x1xf32, #tpu.memory_space<vmem>>, %arg4: memref<16x16xf32, #tpu.memory_space<vmem>>, %arg5: memref<16x1xf32, #tpu.memory_space<vmem>>, %arg6: memref<10x16xf32, #tpu.memory_space<vmem>>, %arg7: memref<10x1xf32, #tpu.memory_space<vmem>>, %arg8: memref<10x128xf32, #tpu.memory_space<vmem>>) attributes {dimension_semantics = [#tpu.dimension_semantics<parallel>], iteration_bounds = array<i64: 1>, scalar_prefetch = 0 : i64, scratch_operands = 0 : i64, tpu.core_type = #tpu.core_type<tc>, window_params = [{transform_indices = @transform_0, window_bounds = array<i64: 10, 128>}, {pipeline_mode = #tpu.pipeline_mode<synchronous>, transform_indices = @transform_1, window_bounds = array<i64: 16, 10>}, {pipeline_mode = #tpu.pipeline_mode<synchronous>, transform_indices = @transform_2, window_bounds = array<i64: 16, 1>}, {pipeline_mode = #tpu.pipeline_mode<synchronous>, transform_indices = @transform_3, window_bounds = array<i64: 16, 16>}, {pipeline_mode = #tpu.pipeline_mode<synchronous>, transform_indices = @transform_4, window_bounds = array<i64: 16, 1>}, {pipeline_mode = #tpu.pipeline_mode<synchronous>, transform_indices = @transform_5, window_bounds = array<i64: 10, 16>}, {pipeline_mode = #tpu.pipeline_mode<synchronous>, transform_indices = @transform_6, window_bounds = array<i64: 10, 1>}, {transform_indices = @transform_7, window_bounds = array<i64: 10, 128>}]} {
    %c0 = arith.constant 0 : index
    %c0_0 = arith.constant 0 : index
    %0 = vector.load %arg1[%c0, %c0_0] : memref<10x128xf32, #tpu.memory_space<vmem>>, vector<10x128xf32>
    %c0_1 = arith.constant 0 : index
    %c0_2 = arith.constant 0 : index
    %1 = vector.load %arg2[%c0_1, %c0_2] : memref<16x10xf32, #tpu.memory_space<vmem>>, vector<16x10xf32>
    %cst = arith.constant dense<0.000000e+00> : vector<16x128xf32>
    %2 = tpu.matmul %1, %0, %cst {dimension_numbers = #tpu.dot_dimension_numbers<[1], [0], [0], [1], [0, 0, 1, 1], [], []>} : vector<16x10xf32>, vector<10x128xf32>, vector<16x128xf32> -> vector<16x128xf32>
    %c0_3 = arith.constant 0 : index
    %c0_4 = arith.constant 0 : index
    %3 = vector.load %arg3[%c0_3, %c0_4] : memref<16x1xf32, #tpu.memory_space<vmem>>, vector<16x1xf32>
    %4 = vector.broadcast %3 : vector<16x1xf32> to vector<16x128xf32>
    %5 = arith.addf %2, %4 : vector<16x128xf32>
    %cst_5 = arith.constant 0.000000e+00 : f32
    %6 = vector.broadcast %cst_5 : f32 to vector<16x128xf32>
    %7 = arith.maximumf %5, %6 : vector<16x128xf32>
    %c0_6 = arith.constant 0 : index
    %c0_7 = arith.constant 0 : index
    %8 = vector.load %arg4[%c0_6, %c0_7] : memref<16x16xf32, #tpu.memory_space<vmem>>, vector<16x16xf32>
    %cst_8 = arith.constant dense<0.000000e+00> : vector<16x128xf32>
    %9 = tpu.matmul %8, %7, %cst_8 {dimension_numbers = #tpu.dot_dimension_numbers<[1], [0], [0], [1], [0, 0, 1, 1], [], []>} : vector<16x16xf32>, vector<16x128xf32>, vector<16x128xf32> -> vector<16x128xf32>
    %c0_9 = arith.constant 0 : index
    %c0_10 = arith.constant 0 : index
    %10 = vector.load %arg5[%c0_9, %c0_10] : memref<16x1xf32, #tpu.memory_space<vmem>>, vector<16x1xf32>
    %11 = vector.broadcast %10 : vector<16x1xf32> to vector<16x128xf32>
    %12 = arith.addf %9, %11 : vector<16x128xf32>
    %cst_11 = arith.constant 0.000000e+00 : f32
    %13 = vector.broadcast %cst_11 : f32 to vector<16x128xf32>
    %14 = arith.maximumf %12, %13 : vector<16x128xf32>
    %c0_12 = arith.constant 0 : index
    %c0_13 = arith.constant 0 : index
    %15 = vector.load %arg6[%c0_12, %c0_13] : memref<10x16xf32, #tpu.memory_space<vmem>>, vector<10x16xf32>
    %cst_14 = arith.constant dense<0.000000e+00> : vector<10x128xf32>
    %16 = tpu.matmul %15, %14, %cst_14 {dimension_numbers = #tpu.dot_dimension_numbers<[1], [0], [0], [1], [0, 0, 1, 1], [], []>} : vector<10x16xf32>, vector<16x128xf32>, vector<10x128xf32> -> vector<10x128xf32>
    %c0_15 = arith.constant 0 : index
    %c0_16 = arith.constant 0 : index
    %17 = vector.load %arg7[%c0_15, %c0_16] : memref<10x1xf32, #tpu.memory_space<vmem>>, vector<10x1xf32>
    %18 = vector.broadcast %17 : vector<10x1xf32> to vector<10x128xf32>
    %19 = arith.addf %16, %18 : vector<10x128xf32>
    %c0_17 = arith.constant 0 : index
    %c0_18 = arith.constant 0 : index
    %20 = vector.load %arg8[%c0_17, %c0_18] : memref<10x128xf32, #tpu.memory_space<vmem>>, vector<10x128xf32>
    tpu.vector_store %arg8[%c0_17, %c0_18], %19 {strides = array<i32>} : memref<10x128xf32, #tpu.memory_space<vmem>>, vector<10x128xf32>,
    return
  }
  func.func @transform_0(%arg0: i32) -> (i32, i32) {
    %c0_i32 = arith.constant 0 : i32
    %c0_i32_0 = arith.constant 0 : i32
    return %c0_i32, %arg0 : i32, i32
  }
  func.func @transform_1(%arg0: i32) -> (i32, i32) {
    %c0_i32 = arith.constant 0 : i32
    %c0_i32_0 = arith.constant 0 : i32
    %c0_i32_1 = arith.constant 0 : i32
    return %c0_i32, %c0_i32_0 : i32, i32
  }
  func.func @transform_2(%arg0: i32) -> (i32, i32) {
    %c0_i32 = arith.constant 0 : i32
    %c0_i32_0 = arith.constant 0 : i32
    %c0_i32_1 = arith.constant 0 : i32
    return %c0_i32, %c0_i32_0 : i32, i32
  }
  func.func @transform_3(%arg0: i32) -> (i32, i32) {
    %c0_i32 = arith.constant 0 : i32
    %c0_i32_0 = arith.constant 0 : i32
    %c0_i32_1 = arith.constant 0 : i32
    return %c0_i32, %c0_i32_0 : i32, i32
  }
  func.func @transform_4(%arg0: i32) -> (i32, i32) {
    %c0_i32 = arith.constant 0 : i32
    %c0_i32_0 = arith.constant 0 : i32
    %c0_i32_1 = arith.constant 0 : i32
    return %c0_i32, %c0_i32_0 : i32, i32
  }
  func.func @transform_5(%arg0: i32) -> (i32, i32) {
    %c0_i32 = arith.constant 0 : i32
    %c0_i32_0 = arith.constant 0 : i32
    %c0_i32_1 = arith.constant 0 : i32
    return %c0_i32, %c0_i32_0 : i32, i32
  }
  func.func @transform_6(%arg0: i32) -> (i32, i32) {
    %c0_i32 = arith.constant 0 : i32
    %c0_i32_0 = arith.constant 0 : i32
    %c0_i32_1 = arith.constant 0 : i32
    return %c0_i32, %c0_i32_0 : i32, i32
  }
  func.func @transform_7(%arg0: i32) -> (i32, i32) {
    %c0_i32 = arith.constant 0 : i32
    %c0_i32_0 = arith.constant 0 : i32
    return %c0_i32, %arg0 : i32, i32
  }
}

</mosaic_0001>

<bundles_post_ra>
// kernel: tpu_custom_call.1
= control target key start
LH: loop header
LB: loop body
LE: loop exit
PB: predicated region body
PF: predicated region fallthrough
CT: control target
= control target key end

     0   :  { %vm50_vm0 = vcmask 1041408   ;;  %vm427_vm1 = vmmov 1   ;;  %vm43_vm3 = vcmask 80896   ;;  %v428_v5 = vmov 0   ;;  %s530_s0 = inlined_call_operand.vmem [shape: f32[10,128], index: 0, kind: input, shape index: {}]   ;;  %s531_s1 = inlined_call_operand.vmem [shape: f32[16,10], index: 1, kind: input, shape index: {}]   ;;  %s532_s2 = inlined_call_operand.vmem [shape: f32[16,1], index: 2, kind: input, shape index: {}]   ;;  %s533_s3 = inlined_call_operand.vmem [shape: f32[16,16], index: 3, kind: input, shape index: {}]   ;;  %s534_s4 = inlined_call_operand.vmem [shape: f32[16,1], index: 4, kind: input, shape index: {}]   ;;  %s535_s5 = inlined_call_operand.vmem [shape: f32[10,16], index: 5, kind: input, shape index: {}]   ;;  %s536_s6 = inlined_call_operand.vmem [shape: f32[10,1], index: 6, kind: input, shape index: {}]   ;;  %s537_s7 = inlined_call_operand.hbm [shape: f32[10,128], index: 7, kind: output, shape index: {}]  }
   0x1   :  { %v27_v0 = vld [vmem:[%s530_s0] sm:$0xff]  ;;  %v28_v1 = vld [vmem:[%s530_s0 + $0x8] sm:$0x3]  ;;  %vm383_vm2 = vmpackc.low %vm50_vm0, %vm427_vm1  ;;  %401 = vset.pattern.permute.xlu0 %v428_v5 }
   0x2   :  { %v29_v2 = vld [vmem:[%s531_s1] sm:$0xff]  ;;  %v382_v3 = vpack.c.bf16 %v28_v1, %v27_v0 }
   0x3   :  { %v31_v4 = vld [vmem:[%s532_s2] sm:$0xff]  ;;  %365 = vmatprep.mubr.msk.f32.mxu0 %vm43_vm3, %v29_v2 }
   0x4   :  { %12 = vsyncpa [#allocation3], 0  ;;  %384 = vmatprep.subr.msk.bf16.mxu0 %vm383_vm2, %v382_v3  ;;  %35 = vperm.xlu0 %401, %v31_v4   ;;  %v30_v6 = vld [vmem:[%s531_s1 + $0x8] sm:$0xff]  ;;  %v231_v8 = vld [vmem:[%s536_s6] sm:$0xff]  ;;  %vm145_vm4 = vcmask 130048   ;;  %s429_s23 = smov [#allocation2]  }
   0x5   :  { %387 = vmatpush3.bf16.msk.msra.mxu0 %vm383_vm2, %v382_v3  ;;  %v32_v7 = vld [vmem:[%s532_s2 + $0x8] sm:$0xff]  ;;  %402 = vset.pattern.permute.xlu1 %v428_v5  ;;  %v131_v9 = vld [vmem:[%s533_s3] sm:$0xff]  ;;  %s331_s24 = sshll.u32 %s429_s23, 4  ;;  %s332_s24 = int_to_ptr.vmem [resolvable:$true] %s331_s24 }
   0x6   :  { %372 = vmatprep.mubr.msk.f32.mxu1 %vm145_vm4, %v131_v9  ;;  %v133_v10 = vld [vmem:[%s534_s4] sm:$0xff]  ;;  %v134_v11 = vld [vmem:[%s534_s4 + $0x8] sm:$0xff]  ;;  %s403_s25 = scalar_lea.vmem %s332_s24, 256  ;;  %p408_p1 = scmp.lt.s32.totalorder %s332_s24, %s332_s24 }
   0x7   :  { %137 = vperm.xlu1 %402, %v133_v10   ;;  %v232_v12 = vld [vmem:[%s536_s6 + $0x8] sm:$0x3]  ;;  %v229_v23 = vld [vmem:[%s535_s5] sm:$0xff]  ;;  %p404_p0 = scmp.ne.s32.totalorder %s332_s24, %s403_s25  ;;  %p409_p2 = scmp.lt.s32.totalorder %s403_s25, %s403_s25 }
   0x8   :  { %366 = vmatmul.mubr.msk.f32.vlgmr.msra.gmra.mrb[0].mxu0 %vm43_vm3, %v30_v6  ;;  %40 = vperm.xlu0 %401, %v32_v7   ;;  %v132_v22 = vld [vmem:[%s533_s3 + $0x8] sm:$0xff] }
   0x9   :  { %379 = vmatprep.mubr.msk.f32.mxu0 %vm145_vm4, %v229_v23  ;;  %v230_v33 = vld [vmem:[%s535_s5 + $0x8] sm:$0x3]  ;;  %p410_p3 = por %p409_p2, %p408_p1 }
   0xb   :  { %142 = vperm.xlu1 %402, %v134_v11   ;;  %p411_p4 = pnand %p410_p3, %p404_p0 }
   0xc   :  { %235 = vperm.xlu0 %401, %v231_v8  }
   0xf   :  { %240 = vperm.xlu1 %402, %v232_v12  }
  0x83   :  { %v36_v13 = vpop.permute.xlu0 %35 }
  0x86   :  { %v138_v24 = vpop.permute.xlu1 %137 }
  0x87   :  { %v41_v14 = vpop.permute.xlu0 %40 }
  0x8a   :  { %v143_v25 = vpop.permute.xlu1 %142 }
  0x8b   :  { %v236_v36 = vpop.permute.xlu0 %235 }
  0x8e   :  { %v241_v34 = vpop.permute.xlu1 %240 }
  0xdb   :  { %v367_v15 = vpop.f32.mrb[0].mxu0 }
  0xdc   :  { %v126_v16 = vadd.f32 %v367_v15, %v41_v14  ;;  %v120_v17 = vpop.f32.mrb[1].mxu0 }
  0xdd   :  { %v121_v18 = vadd.f32 %v120_v17, %v36_v13 }
  0xde   :  { %v130_v19 = vmax.f32 %v126_v16, 0.0 }
  0xdf   :  { %v129_v20 = vmax.f32 %v121_v18, 0.0 }
  0xe1   :  { %v388_v21 = vpack.c.bf16 %v130_v19, %v129_v20 }
  0xe3   :  { %389 = vmatprep.subr.bf16.mxu1 %v388_v21 }
  0xe4   :  { %391 = vmatpush3.bf16.msra.mxu1 %v388_v21 }
  0xe7   :  { %373 = vmatmul.mubr.msk.f32.vlgmr.msra.gmra.mrb[0].mxu1 %vm145_vm4, %v132_v22 }
 0x1ba   :  { %v374_v26 = vpop.f32.mrb[0].mxu1 }
 0x1bb   :  { %v224_v27 = vadd.f32 %v374_v26, %v143_v25  ;;  %v218_v28 = vpop.f32.mrb[1].mxu1 }
 0x1bc   :  { %v219_v29 = vadd.f32 %v218_v28, %v138_v24 }
 0x1bd   :  { %v228_v30 = vmax.f32 %v224_v27, 0.0 }
 0x1be   :  { %v227_v31 = vmax.f32 %v219_v29, 0.0 }
 0x1c0   :  { %v392_v32 = vpack.c.bf16 %v228_v30, %v227_v31 }
 0x1c2   :  { %393 = vmatprep.subr.bf16.mxu0 %v392_v32 }
 0x1c3   :  { %395 = vmatpush3.bf16.msra.mxu0 %v392_v32 }
 0x1c6   :  { %380 = vmatmul.mubr.msk.f32.vlgmr.msra.gmra.mrb[2].mxu0 %vm145_vm4, %v230_v33 }
 0x299   :  { %v381_v35 = vpop.f32.mrb[2].mxu0 }
 0x29a   :  { %v321_v37 = vadd.f32 %v381_v35, %v241_v34  ;;  %v315_v38 = vpop.f32.mrb[3].mxu0 }
 0x29b   :  { %v316_v39 = vadd.f32 %v315_v38, %v236_v36 }
 0x29c   :  { %325 = vst [vmem:[#allocation2 + $0x8] sm:$0x3] %v321_v37 }
 0x29d   :  { %324 = vst [vmem:[#allocation2] sm:$0xff] %v316_v39 }
 0x29e   :  { %414 = shalt.err (!%p411_p4)
}
 0x29f   :  { %s415_s27 = scalar_lea.hbm %s537_s7, 256 }
 0x2a0   :  { %p416_p5 = scmp.ne.s32.totalorder %s537_s7, %s415_s27  ;;  %p419_p6 = scmp.lt.u32.totalorder %s415_s27, %s537_s7 }
 0x2a2   :  { %p421_p7 = pnand %p419_p6, %p416_p5 }
 0x2a4   :  { %424 = shalt.err (!%p421_p7)
}
 0x2a5   :  { %s430_s0 = smov 128   ;;  %s431_s9 = smov 8  }
 0x2a6   :  { %337 = dma.vmem_to_hbm [thread:$0]  %s332_s24, 256, %s537_s7, [#allocation3], %s430_s0, %s430_s0, %s431_s9  }
 0x2a7   :  { %425 = dma.done.wait [#allocation3], 256  }
 0x2a8   :  { %426 = vsyncadd [#allocation3], 4294967040 }
 0x2a9   :  { %341 = vsyncpa [#allocation3], 1 }

</bundles_post_ra>
